<compile_context>
chip_gen: v5e
topology: v5e:2x2
jax: 0.10.0
libtpu: 0.0.40
codegen_flags: <defaults>
</compile_context>

<pallas_src>
import functools
import math

import jax
import jax.numpy as jnp
from jax.experimental import pallas as pl
from jax.experimental.pallas import tpu as pltpu


WEIGHT_DTYPE = jnp.bfloat16          # weights + KV cache streamed as bf16
_VMEM_LIMIT = 64 * 1024 * 1024       # explicit scoped-VMEM cap (fits all gens)


def _pick_tile(n, max_tile=512):
    """Largest MXU-friendly (256/128-multiple) tile <= max_tile dividing n."""
    if n <= max_tile:
        return n
    for step in (256, 128):
        t = (max_tile // step) * step
        while t >= step:
            if n % t == 0:
                return t
            t -= step
    return n


def _pick_seq_tile(n, max_tile=512):
    """Sequence tile: multiple of 8 dividing n (else the full length)."""
    if n <= max_tile:
        return n
    t = max_tile
    while t >= 8:
        if n % t == 0 and t % 8 == 0:
            return t
        t -= 8
    return n


# ----------------------------------------------------------------------------
# Weight-streaming kernels (RMSNorm + matmul, o-proj + residual, SwiGLU FFN)
# ----------------------------------------------------------------------------

def _norm_matmul_kernel(x_ref, nw_ref, w_ref, o_ref, *, eps):
    """Fused RMSNorm + (x_norm @ W^T) for one output-column tile.

    The norm is recomputed per tile: it is cheap VALU/XLU work hidden under
    the weight-tile DMA, and keeping the tile axis "parallel" (v7x megacore)
    is worth more than hoisting it (which would force "arbitrary")."""
    x = x_ref[...]
    ms = jnp.mean(x * x, axis=-1, keepdims=True)
    xn = (x * jax.lax.rsqrt(ms + eps)) * nw_ref[...]
    o_ref[...] = jnp.dot(xn.astype(w_ref.dtype), w_ref[...],
                         preferred_element_type=jnp.float32)


def norm_matmul_pallas(x, norm_w, wT, eps):
    """x: (M, K) f32, norm_w: (K,) f32, wT: (K, N) bf16 -> (M, N) f32."""
    M, K = x.shape
    N = wT.shape[1]
    tn = _pick_tile(N)
    return pl.pallas_call(
        functools.partial(_norm_matmul_kernel, eps=eps),
        out_shape=jax.ShapeDtypeStruct((M, N), jnp.float32),
        grid=(N // tn,),
        in_specs=[pl.BlockSpec((M, K), lambda j: (0, 0)),
                  pl.BlockSpec((1, K), lambda j: (0, 0)),
                  pl.BlockSpec((K, tn), lambda j: (0, j))],
        out_specs=pl.BlockSpec((M, tn), lambda j: (0, j)),
        compiler_params=pltpu.CompilerParams(
            dimension_semantics=("parallel",),
            vmem_limit_bytes=_VMEM_LIMIT),
    )(x, norm_w.reshape(1, K).astype(jnp.float32), wT)


def _linear_residual_kernel(x_ref, w_ref, r_ref, o_ref):
    o_ref[...] = r_ref[...] + jnp.dot(x_ref[...].astype(w_ref.dtype),
                                      w_ref[...],
                                      preferred_element_type=jnp.float32)


def linear_residual_pallas(x, wT, res):
    """(res + x @ W^T): x (M, K) f32, wT (K, N) bf16, res (M, N) f32."""
    M, K = x.shape
    N = wT.shape[1]
    tn = _pick_tile(N)
    return pl.pallas_call(
        _linear_residual_kernel,
        out_shape=jax.ShapeDtypeStruct((M, N), jnp.float32),
        grid=(N // tn,),
        in_specs=[pl.BlockSpec((M, K), lambda j: (0, 0)),
                  pl.BlockSpec((K, tn), lambda j: (0, j)),
                  pl.BlockSpec((M, tn), lambda j: (0, j))],
        out_specs=pl.BlockSpec((M, tn), lambda j: (0, j)),
        compiler_params=pltpu.CompilerParams(
            dimension_semantics=("parallel",),
            vmem_limit_bytes=_VMEM_LIMIT),
    )(x, wT, res)


def _norm_ffn_kernel(x_ref, nw_ref, w1_ref, w3_ref, w2_ref, r_ref, o_ref,
                     xn_ref, *, eps):
    """Fused RMSNorm + SwiGLU FFN + w2 + residual, tiled over the hidden dim.

    RMSNorm is hoisted (computed once at j == 0 into a bf16 scratch) and the
    w2 partial products accumulate directly into the resident output block."""
    j = pl.program_id(0)

    @pl.when(j == 0)
    def _():
        x = x_ref[...]
        ms = jnp.mean(x * x, axis=-1, keepdims=True)
        xn_ref[...] = ((x * jax.lax.rsqrt(ms + eps)) * nw_ref[...]
                       ).astype(xn_ref.dtype)
        o_ref[...] = r_ref[...]

    xn = xn_ref[...]
    h1 = jnp.dot(xn, w1_ref[...], preferred_element_type=jnp.float32)
    h3 = jnp.dot(xn, w3_ref[...], preferred_element_type=jnp.float32)
    g = (h1 * jax.nn.sigmoid(h1)) * h3                    # SiLU(w1 x) * (w3 x)
    o_ref[...] += jnp.dot(g.astype(w2_ref.dtype), w2_ref[...],
                          preferred_element_type=jnp.float32)


def ffn_pallas(x, norm_w, w1T, w3T, w2T, res, eps):
    """x/res: (M, D) f32; w1T/w3T: (D, H) bf16; w2T: (H, D) bf16 -> (M, D)."""
    M, D = x.shape
    Hh = w1T.shape[1]
    th = _pick_tile(Hh)
    return pl.pallas_call(
        functools.partial(_norm_ffn_kernel, eps=eps),
        out_shape=jax.ShapeDtypeStruct((M, D), jnp.float32),
        grid=(Hh // th,),
        in_specs=[pl.BlockSpec((M, D), lambda j: (0, 0)),
                  pl.BlockSpec((1, D), lambda j: (0, 0)),
                  pl.BlockSpec((D, th), lambda j: (0, j)),
                  pl.BlockSpec((D, th), lambda j: (0, j)),
                  pl.BlockSpec((th, D), lambda j: (j, 0)),
                  pl.BlockSpec((M, D), lambda j: (0, 0))],
        out_specs=pl.BlockSpec((M, D), lambda j: (0, 0)),
        scratch_shapes=[pltpu.VMEM((M, D), WEIGHT_DTYPE)],
        compiler_params=pltpu.CompilerParams(
            dimension_semantics=("arbitrary",),
            vmem_limit_bytes=_VMEM_LIMIT),
    )(x, norm_w.reshape(1, D).astype(jnp.float32), w1T, w3T, w2T, res)


# ----------------------------------------------------------------------------
# KV-cache single-token insert (HBM-resident caches, token-row DMA only)
# ----------------------------------------------------------------------------

def _kv_insert_kernel(sp_ref, xk_ref, xv_ref, ck_in, cv_in, ck_out, cv_out,
                      sem):
    del ck_in, cv_in          # same buffers as the outputs (aliased)
    b = pl.program_id(0)
    sp = sp_ref[0]
    cpk = pltpu.make_async_copy(
        xk_ref, ck_out.at[pl.ds(b, 1), :, pl.ds(sp, 1), :], sem.at[0])
    cpv = pltpu.make_async_copy(
        xv_ref, cv_out.at[pl.ds(b, 1), :, pl.ds(sp, 1), :], sem.at[1])
    cpk.start()
    cpv.start()
    cpk.wait()
    cpv.wait()


def kv_insert_pallas(start_pos, xk4, xv4, cache_k, cache_v):
    """Write the new token's K/V row into the HBM caches.

    xk4/xv4: (B, KVH, 1, hd) bf16; caches: (maxB, KVH, L, hd) bf16.
    Only the (KVH, 1, hd) row per batch element touches HBM; the caches never
    round-trip through VMEM.  True in-place under jit + buffer donation."""
    B, KVH, _, hd = xk4.shape
    sp = jnp.asarray([start_pos], jnp.int32)
    return pl.pallas_call(
        _kv_insert_kernel,
        grid=(B,),
        in_specs=[pl.BlockSpec(memory_space=pltpu.MemorySpace.SMEM),
                  pl.BlockSpec((1, KVH, 1, hd), lambda b: (b, 0, 0, 0)),
                  pl.BlockSpec((1, KVH, 1, hd), lambda b: (b, 0, 0, 0)),
                  pl.BlockSpec(memory_space=pl.ANY),
                  pl.BlockSpec(memory_space=pl.ANY)],
        out_specs=(pl.BlockSpec(memory_space=pl.ANY),
                   pl.BlockSpec(memory_space=pl.ANY)),
        out_shape=(jax.ShapeDtypeStruct(cache_k.shape, cache_k.dtype),
                   jax.ShapeDtypeStruct(cache_v.shape, cache_v.dtype)),
        scratch_shapes=[pltpu.SemaphoreType.DMA((2,))],
        input_output_aliases={3: 0, 4: 1},
        compiler_params=pltpu.CompilerParams(
            dimension_semantics=("arbitrary",)),
    )(sp, xk4, xv4, cache_k, cache_v)


# ----------------------------------------------------------------------------
# GQA decode attention: flash-style online softmax over L tiles
# ----------------------------------------------------------------------------

def _gqa_flash_kernel(sp_ref, q_ref, k_ref, v_ref, o_ref, m_sc, l_sc, acc_sc,
                      *, scale, tl):
    lt = pl.program_id(2)
    sp = sp_ref[0]

    @pl.when(lt == 0)
    def _():
        m_sc[...] = jnp.full(m_sc.shape, -1e30, dtype=jnp.float32)
        l_sc[...] = jnp.zeros(l_sc.shape, dtype=jnp.float32)
        acc_sc[...] = jnp.zeros(acc_sc.shape, dtype=jnp.float32)

    # Skip tiles that contain no attended position (positions 0..sp).
    @pl.when(lt * tl <= sp)
    def _():
        q = q_ref[0, 0]                               # (n_rep, hd) bf16
        k = k_ref[0, 0]                               # (tl, hd)    bf16
        v = v_ref[0, 0]
        s = jax.lax.dot_general(q, k, (((1,), (1,)), ((), ())),
                                preferred_element_type=jnp.float32) * scale
        pos = lt * tl + jax.lax.broadcasted_iota(jnp.int32, s.shape, 1)
        s = jnp.where(pos <= sp, s, -1e30)
        m_new = jnp.maximum(m_sc[...], jnp.max(s, axis=-1, keepdims=True))
        alpha = jnp.exp(m_sc[...] - m_new)
        p = jnp.exp(s - m_new)
        l_sc[...] = alpha * l_sc[...] + jnp.sum(p, axis=-1, keepdims=True)
        acc_sc[...] = alpha * acc_sc[...] + jnp.dot(
            p.astype(v.dtype), v, preferred_element_type=jnp.float32)
        m_sc[...] = m_new

    @pl.when(lt == pl.num_programs(2) - 1)
    def _():
        o_ref[0, 0] = acc_sc[...] * pl.reciprocal(l_sc[...], approx=True)


def attention_pallas(start_pos, q4, xk4, xv4, cache_k, cache_v, *, scale):
    """q4: (B, KVH, n_rep, hd); xk4/xv4: (B, KVH, 1, hd);
    caches: (maxB, KVH, L, hd) kv-head-major bf16.
    Returns (new_cache_k, new_cache_v, attn (B, KVH, n_rep, hd) f32)."""
    B, KVH, n_rep, hd = q4.shape
    _, _, L, _ = cache_k.shape

    # 1) token-row cache write (in place under jit + donation).
    nk, nv = kv_insert_pallas(start_pos, xk4, xv4, cache_k, cache_v)

    # 2) online-softmax attention over the updated cache, tiled along L.
    tl = _pick_seq_tile(L)
    nl = L // tl
    sp = jnp.asarray([start_pos], jnp.int32)

    def kv_map(b, g, lt, sp_ref):
        # Clamp so tiles beyond start_pos revisit the same block (no DMA).
        return (b, g, jnp.minimum(lt, sp_ref[0] // tl), 0)

    attn = pl.pallas_call(
        functools.partial(_gqa_flash_kernel, scale=scale, tl=tl),
        out_shape=jax.ShapeDtypeStruct((B, KVH, n_rep, hd), jnp.float32),
        grid_spec=pltpu.PrefetchScalarGridSpec(
            num_scalar_prefetch=1,
            grid=(B, KVH, nl),
            in_specs=[
                pl.BlockSpec((1, 1, n_rep, hd),
                             lambda b, g, lt, sp_ref: (b, g, 0, 0)),
                pl.BlockSpec((1, 1, tl, hd), kv_map),
                pl.BlockSpec((1, 1, tl, hd), kv_map),
            ],
            out_specs=pl.BlockSpec((1, 1, n_rep, hd),
                                   lambda b, g, lt, sp_ref: (b, g, 0, 0)),
            scratch_shapes=[pltpu.VMEM((n_rep, 1), jnp.float32),
                            pltpu.VMEM((n_rep, 1), jnp.float32),
                            pltpu.VMEM((n_rep, hd), jnp.float32)]),
        compiler_params=pltpu.CompilerParams(
            dimension_semantics=("parallel", "parallel", "arbitrary")),
    )(sp, q4, nk, nv)
    return nk, nv, attn


# ----------------------------------------------------------------------------
# Pure-JAX references (same bf16-weight math) for the in-script check
# ----------------------------------------------------------------------------

def norm_matmul_ref(x, norm_w, wT, eps):
    ms = jnp.mean(x * x, axis=-1, keepdims=True)
    xn = (x * jax.lax.rsqrt(ms + eps)) * norm_w[None, :]
    return jnp.dot(xn.astype(wT.dtype), wT, preferred_element_type=jnp.float32)


def linear_residual_ref(x, wT, res):
    return res + jnp.dot(x.astype(wT.dtype), wT,
                         preferred_element_type=jnp.float32)


def ffn_ref(x, norm_w, w1T, w3T, w2T, res, eps):
    ms = jnp.mean(x * x, axis=-1, keepdims=True)
    xn = ((x * jax.lax.rsqrt(ms + eps)) * norm_w[None, :]).astype(w1T.dtype)
    h1 = jnp.dot(xn, w1T, preferred_element_type=jnp.float32)
    h3 = jnp.dot(xn, w3T, preferred_element_type=jnp.float32)
    g = (h1 * jax.nn.sigmoid(h1)) * h3
    return res + jnp.dot(g.astype(w2T.dtype), w2T,
                         preferred_element_type=jnp.float32)


def attention_ref(start_pos, q4, xk4, xv4, cache_k, cache_v, *, scale):
    B = q4.shape[0]
    nk = cache_k.at[:B, :, start_pos, :].set(xk4[:, :, 0, :])
    nv = cache_v.at[:B, :, start_pos, :].set(xv4[:, :, 0, :])
    keys = nk[:B, :, :start_pos + 1, :]
    vals = nv[:B, :, :start_pos + 1, :]
    s = jnp.einsum('bgnd,bgld->bgnl', q4, keys,
                   preferred_element_type=jnp.float32) * scale
    m = jnp.max(s, axis=-1, keepdims=True)
    p = jnp.exp(s - m)
    pn = (p / jnp.sum(p, axis=-1, keepdims=True)).astype(vals.dtype)
    o = jnp.einsum('bgnl,bgld->bgnd', pn, vals,
                   preferred_element_type=jnp.float32)
    return nk, nv, o


PALLAS_OPS = dict(norm_matmul=norm_matmul_pallas,
                  linear_residual=linear_residual_pallas,
                  ffn=ffn_pallas,
                  attention=attention_pallas)
REF_OPS = dict(norm_matmul=norm_matmul_ref,
               linear_residual=linear_residual_ref,
               ffn=ffn_ref,
               attention=attention_ref)


# ----------------------------------------------------------------------------
# Model glue (embedding gather, rotary embeddings, residual plumbing)
# ----------------------------------------------------------------------------

def ffn_hidden_dim(dim, multiple_of, ffn_dim_multiplier=None):
    hidden = int(2 * (4 * dim) / 3)
    if ffn_dim_multiplier is not None:
        hidden = int(ffn_dim_multiplier * dim)
    return multiple_of * ((hidden + multiple_of - 1) // multiple_of)


def precompute_theta_cos_frequencies(head_dim, seq_len, theta=10000.0):
    assert head_dim % 2 == 0
    inv = 1.0 / (theta ** (jnp.arange(0, head_dim, 2, dtype=jnp.float32)
                           / head_dim))
    m = jnp.arange(seq_len, dtype=jnp.float32)
    freqs = jnp.outer(m, inv)
    return jnp.cos(freqs), jnp.sin(freqs)        # each (seq_len, head_dim//2)


def apply_rotary(x, cos, sin):
    """x: (B, S, H, D); cos/sin: (S, D//2).  Matches view_as_complex pairing."""
    B, S, H, D = x.shape
    xr = x.reshape(B, S, H, D // 2, 2)
    x0, x1 = xr[..., 0], xr[..., 1]
    c = cos[None, :, None, :]
    s = sin[None, :, None, :]
    out = jnp.stack([x0 * c - x1 * s, x0 * s + x1 * c], axis=-1)
    return out.reshape(B, S, H, D)


def init_raw_params(key, cfg):
    dim = cfg['dim']
    H, KVH = cfg['n_heads'], cfg['n_kv_heads']
    hd = dim // H
    hidden = ffn_hidden_dim(dim, cfg['multiple_of'])
    vocab = cfg['vocab_size']

    def nrm(k, shape, scale=0.02):
        return scale * jax.random.normal(k, shape, jnp.float32)

    keys = jax.random.split(key, 2 + cfg['n_layers'])
    raw = {'tok_emb': nrm(keys[0], (vocab, dim)),
           'norm_w': jnp.ones((dim,), jnp.float32),
           'output': nrm(keys[1], (vocab, dim)),
           'layers': []}
    for l in range(cfg['n_layers']):
        lk = jax.random.split(keys[2 + l], 7)
        raw['layers'].append({
            'attn_norm': jnp.ones((dim,), jnp.float32),
            'ffn_norm': jnp.ones((dim,), jnp.float32),
            'wq': nrm(lk[0], (H * hd, dim)),
            'wk': nrm(lk[1], (KVH * hd, dim)),
            'wv': nrm(lk[2], (KVH * hd, dim)),
            'wo': nrm(lk[3], (dim, H * hd)),
            'w1': nrm(lk[4], (hidden, dim)),
            'w2': nrm(lk[5], (dim, hidden)),
            'w3': nrm(lk[6], (hidden, dim)),
        })
    return raw


def prepare_params(raw):
    """One-time packing: stack QKV, pre-transpose, cast weights to bf16."""
    params = {'tok_emb': raw['tok_emb'].astype(WEIGHT_DTYPE),
              'norm_w': raw['norm_w'],
              'output_T': raw['output'].T.astype(WEIGHT_DTYPE),
              'layers': []}
    for lp in raw['layers']:
        wqkv = jnp.concatenate([lp['wq'], lp['wk'], lp['wv']], axis=0)
        params['layers'].append({
            'attn_norm': lp['attn_norm'],
            'ffn_norm': lp['ffn_norm'],
            'wqkv_T': wqkv.T.astype(WEIGHT_DTYPE),
            'wo_T': lp['wo'].T.astype(WEIGHT_DTYPE),
            'w1_T': lp['w1'].T.astype(WEIGHT_DTYPE),
            'w2_T': lp['w2'].T.astype(WEIGHT_DTYPE),
            'w3_T': lp['w3'].T.astype(WEIGHT_DTYPE),
        })
    return params


def init_caches(cfg):
    hd = cfg['dim'] // cfg['n_heads']
    # kv-head-major layout: contiguous (L, hd) slab per (batch, kv head).
    shape = (cfg['max_batch_size'], cfg['n_kv_heads'], cfg['max_seq_len'], hd)
    return [(jnp.zeros(shape, WEIGHT_DTYPE), jnp.zeros(shape, WEIGHT_DTYPE))
            for _ in range(cfg['n_layers'])]


def transformer_forward(params, caches, tokens, start_pos, cfg,
                        freqs_cos, freqs_sin, ops):
    B, S = tokens.shape
    assert S == 1, 'Only one token should be passed at a time'
    dim = cfg['dim']
    H, KVH = cfg['n_heads'], cfg['n_kv_heads']
    hd = dim // H
    n_rep = H // KVH
    eps = cfg['norm_eps']
    scale = 1.0 / math.sqrt(hd)

    # Embedding gather + rotary are tiny, data-dependent glue kept in XLA.
    h = params['tok_emb'][tokens].astype(jnp.float32).reshape(B * S, dim)
    cos = freqs_cos[start_pos:start_pos + S]
    sin = freqs_sin[start_pos:start_pos + S]

    new_caches = []
    for l, lp in enumerate(params['layers']):
        ck, cv = caches[l]

        # --- fused RMSNorm + packed QKV projection ---
        qkv = ops['norm_matmul'](h, lp['attn_norm'], lp['wqkv_T'], eps)
        q_sz, kv_sz = H * hd, KVH * hd
        xq = qkv[:, :q_sz].reshape(B, S, H, hd)
        xk = qkv[:, q_sz:q_sz + kv_sz].reshape(B, S, KVH, hd)
        xv = qkv[:, q_sz + kv_sz:].reshape(B, S, KVH, hd)
        # TODO(synk): rotary + head split could be folded into the QKV kernel
        # epilogue to shave per-layer XLA glue at batch~1 decode.
        xq = apply_rotary(xq, cos, sin)
        xk = apply_rotary(xk, cos, sin)

        q4 = xq.reshape(B, KVH, n_rep, hd).astype(ck.dtype)
        k4 = xk.reshape(B, KVH, 1, hd).astype(ck.dtype)
        v4 = xv.reshape(B, KVH, 1, hd).astype(ck.dtype)

        # --- token-row cache write + L-tiled online-softmax GQA attention ---
        nk, nv, attn = ops['attention'](start_pos, q4, k4, v4, ck, cv,
                                        scale=scale)
        new_caches.append((nk, nv))

        # --- o-projection fused with residual add ---
        h = ops['linear_residual'](attn.reshape(B * S, H * hd), lp['wo_T'], h)

        # --- fused RMSNorm + SwiGLU FFN + residual add ---
        h = ops['ffn'](h, lp['ffn_norm'], lp['w1_T'], lp['w3_T'], lp['w2_T'],
                       h, eps)

    # --- final RMSNorm fused with the vocab projection ---
    logits = ops['norm_matmul'](h, params['norm_w'], params['output_T'], eps)
    return logits.reshape(B, S, cfg['vocab_size']), new_caches


# ----------------------------------------------------------------------------
# Main
# ----------------------------------------------------------------------------

if __name__ == "__main__":
    cfg = dict(dim=128, n_layers=2, n_heads=4, n_kv_heads=2, vocab_size=256,
               multiple_of=64, norm_eps=1e-5, max_batch_size=2, max_seq_len=16)

    key = jax.random.PRNGKey(0)
    pk, tk = jax.random.split(key)
    params = prepare_params(init_raw_params(pk, cfg))
    caches = init_caches(cfg)

    head_dim = cfg['dim'] // cfg['n_heads']
    freqs_cos, freqs_sin = precompute_theta_cos_frequencies(
        head_dim, cfg['max_seq_len'] * 2)

    batch, seq = 2, 1                   # reference requires seq_len == 1
    start_pos = 3                       # some history already in the cache
    tokens = jax.random.randint(tk, (batch, seq), 0, cfg['vocab_size'],
                                dtype=jnp.int32)

    # Pallas path
    logits, new_caches = transformer_forward(
        params, caches, tokens, start_pos, cfg, freqs_cos, freqs_sin,
        PALLAS_OPS)
    logits = jax.block_until_ready(logits)

    # Pure-JAX reference path (same bf16-weight math)
    logits_ref, ref_caches = transformer_forward(
        params, caches, tokens, start_pos, cfg, freqs_cos, freqs_sin, REF_OPS)
    logits_ref = jax.block_until_ready(logits_ref)

    assert logits.shape == (batch, seq, cfg['vocab_size'])
    max_err = float(jnp.max(jnp.abs(logits - logits_ref)))
    assert max_err < 1e-2, f"logits mismatch vs reference: {max_err}"

    # The DMA'd token row (and the untouched remainder) must match the
    # functional cache update.
    for (pk_, pv_), (rk_, rv_) in zip(new_caches, ref_caches):
        ek = float(jnp.max(jnp.abs(pk_.astype(jnp.float32)
                                   - rk_.astype(jnp.float32))))
        ev = float(jnp.max(jnp.abs(pv_.astype(jnp.float32)
                                   - rv_.astype(jnp.float32))))
        assert ek < 1e-2 and ev < 1e-2, f"cache mismatch: {ek}, {ev}"

    print("KERNEL_OK")
</pallas_src>

<mosaic_0001>
module attributes {stable_mosaic.version = 11 : i64} {
  func.func @_norm_matmul_kernel(%arg0: i32, %arg1: memref<2x128xf32, #tpu.memory_space<vmem>>, %arg2: memref<1x128xf32, #tpu.memory_space<vmem>>, %arg3: memref<128x256xbf16, #tpu.memory_space<vmem>>, %arg4: memref<2x256xf32, #tpu.memory_space<vmem>>) attributes {dimension_semantics = [#tpu.dimension_semantics<parallel>], iteration_bounds = array<i64: 1>, scalar_prefetch = 0 : i64, scratch_operands = 0 : i64, tpu.core_type = #tpu.core_type<tc>, window_params = [{pipeline_mode = #tpu.pipeline_mode<synchronous>, transform_indices = @transform_0, window_bounds = array<i64: 2, 128>}, {pipeline_mode = #tpu.pipeline_mode<synchronous>, transform_indices = @transform_1, window_bounds = array<i64: 1, 128>}, {transform_indices = @transform_2, window_bounds = array<i64: 128, 256>}, {transform_indices = @transform_3, window_bounds = array<i64: 2, 256>}]} {
    %c0 = arith.constant 0 : index
    %c0_0 = arith.constant 0 : index
    %0 = vector.load %arg1[%c0, %c0_0] : memref<2x128xf32, #tpu.memory_space<vmem>>, vector<2x128xf32>
    %1 = arith.mulf %0, %0 : vector<2x128xf32>
    %cst = arith.constant dense<0.000000e+00> : vector<2xf32>
    %2 = vector.multi_reduction <add>, %1, %cst [1] : vector<2x128xf32> to vector<2xf32>
    %3 = vector.shape_cast %2 : vector<2xf32> to vector<2x1xf32>
    %cst_1 = arith.constant 1.280000e+02 : f32
    %4 = vector.broadcast %cst_1 : f32 to vector<2x1xf32>
    %5 = arith.divf %3, %4 : vector<2x1xf32>
    %cst_2 = arith.constant 9.99999974E-6 : f32
    %6 = vector.broadcast %cst_2 : f32 to vector<2x1xf32>
    %7 = arith.addf %5, %6 : vector<2x1xf32>
    %8 = math.rsqrt %7 : vector<2x1xf32>
    %9 = vector.broadcast %8 : vector<2x1xf32> to vector<2x128xf32>
    %10 = arith.mulf %0, %9 : vector<2x128xf32>
    %c0_3 = arith.constant 0 : index
    %c0_4 = arith.constant 0 : index
    %11 = vector.load %arg2[%c0_3, %c0_4] : memref<1x128xf32, #tpu.memory_space<vmem>>, vector<1x128xf32>
    %12 = vector.broadcast %11 : vector<1x128xf32> to vector<2x128xf32>
    %13 = arith.mulf %10, %12 : vector<2x128xf32>
    %14 = arith.truncf %13 : vector<2x128xf32> to vector<2x128xbf16>
    %c0_5 = arith.constant 0 : index
    %c0_6 = arith.constant 0 : index
    %15 = vector.load %arg3[%c0_5, %c0_6] : memref<128x256xbf16, #tpu.memory_space<vmem>>, vector<128x256xbf16>
    %cst_7 = arith.constant dense<0.000000e+00> : vector<2x256xf32>
    %16 = tpu.matmul %14, %15, %cst_7 {dimension_numbers = #tpu.dot_dimension_numbers<[1], [0], [0], [1], [0, 0, 1, 1], [], []>} : vector<2x128xbf16>, vector<128x256xbf16>, vector<2x256xf32> -> vector<2x256xf32>
    %c0_8 = arith.constant 0 : index
    %c0_9 = arith.constant 0 : index
    %17 = vector.load %arg4[%c0_8, %c0_9] : memref<2x256xf32, #tpu.memory_space<vmem>>, vector<2x256xf32>
    tpu.vector_store %arg4[%c0_8, %c0_9], %16 {strides = array<i32>} : memref<2x256xf32, #tpu.memory_space<vmem>>, vector<2x256xf32>,
    return
  }
  func.func @transform_0(%arg0: i32) -> (i32, i32) {
    %c0_i32 = arith.constant 0 : i32
    %c0_i32_0 = arith.constant 0 : i32
    %c0_i32_1 = arith.constant 0 : i32
    return %c0_i32, %c0_i32_0 : i32, i32
  }
  func.func @transform_1(%arg0: i32) -> (i32, i32) {
    %c0_i32 = arith.constant 0 : i32
    %c0_i32_0 = arith.constant 0 : i32
    %c0_i32_1 = arith.constant 0 : i32
    return %c0_i32, %c0_i32_0 : i32, i32
  }
  func.func @transform_2(%arg0: i32) -> (i32, i32) {
    %c0_i32 = arith.constant 0 : i32
    %c0_i32_0 = arith.constant 0 : i32
    return %c0_i32, %arg0 : i32, i32
  }
  func.func @transform_3(%arg0: i32) -> (i32, i32) {
    %c0_i32 = arith.constant 0 : i32
    %c0_i32_0 = arith.constant 0 : i32
    return %c0_i32, %arg0 : i32, i32
  }
}

</mosaic_0001>

<bundles_post_ra>
// kernel: tpu_custom_call.1
= control target key start
LH: loop header
LB: loop body
LE: loop exit
PB: predicated region body
PF: predicated region fallthrough
CT: control target
= control target key end

     0   :  { %8 = vsyncpa [#allocation3], 0  ;;  %s476_s0 = inlined_call_operand.hbm [shape: f32[2,128], index: 0, kind: input, shape index: {}]   ;;  %s477_s1 = inlined_call_operand.hbm [shape: f32[1,128], index: 1, kind: input, shape index: {}]   ;;  %s478_s2 = inlined_call_operand.hbm [shape: bf16[128,256], index: 2, kind: input, shape index: {}]   ;;  %s479_s3 = inlined_call_operand.hbm [shape: f32[2,256], index: 3, kind: output, shape index: {}]  }
   0x1   :  { %9 = vsyncpa [#allocation6], 0  ;;  %s27_s14 = sshll.u32 %s477_s1, 4  ;;  %s28_s14 = int_to_ptr.hbm [resolvable:$true] %s27_s14 }
   0x2   :  { %10 = vsyncpa [#allocation4], 0  ;;  %s430_s15 = smov [#allocation5]   ;;  %s16_s19 = sshll.u32 %s476_s0, 4  ;;  %s17_s19 = int_to_ptr.hbm [resolvable:$true] %s16_s19 }
   0x3   :  { %s29_s16 = sshll.u32 %s430_s15, 4  ;;  %s431_s20 = smov [#allocation2]   ;;  %s30_s16 = int_to_ptr.vmem [resolvable:$true] %s29_s16 }
   0x4   :  { %32 = dma.hbm_to_vmem [thread:$0]  %s28_s14, 16, %s30_s16, [#allocation6]  }
   0x5   :  { %s18_s21 = sshll.u32 %s431_s20, 4  ;;  %s37_s24 = sshll.u32 %s478_s2, 4  ;;  %s19_s21 = int_to_ptr.vmem [resolvable:$true] %s18_s21  ;;  %s38_s24 = int_to_ptr.hbm [resolvable:$true] %s37_s24 }
   0x6   :  { %21 = dma.hbm_to_vmem [thread:$0]  %s17_s19, 32, %s19_s21, [#allocation3]  }
   0x7   :  { %s432_s1 = smov [#allocation7]   ;;  %s433_s26 = smov 128  }
   0x8   :  { %s39_s25 = sshll.u32 %s432_s1, 4  ;;  %s434_s27 = smov 8   ;;  %s40_s25 = int_to_ptr.vmem [resolvable:$true] %s39_s25 }
   0x9   :  { %45 = dma.hbm_to_vmem [thread:$0]  %s38_s24, 2048, %s40_s25, [#allocation6], %s433_s26, %s433_s26, %s434_s27  }
   0xa   :  { %424 = dma.done.wait [#allocation3], 32  }
   0xb   :  { %425 = vsyncadd [#allocation3], 4294967264 }
   0xc   :  { %426 = dma.done.wait [#allocation6], 2064  }
   0xd   :  { %427 = vsyncadd [#allocation6], 4294965232  ;;  %vm60_vm0 = vcmask 1041408   ;;  %v466_v0 = vld [vmem:[#allocation2] sm:$0x3]  ;;  %v435_v18 = vmov 128.0  }
   0xe   :  { %v294_v1 = vld [vmem:[#allocation7 + $0x70] sm:$0xf]  ;;  %v315_v2 = vld [vmem:[#allocation7 + $0x74] sm:$0xf0]  ;;  %v59_v3 = vmul.f32 %v466_v0, %v466_v0  ;;  %v314_v5 = vld [vmem:[#allocation7 + $0x74] sm:$0xf]  ;;  %324 = vrcp.f32 %v435_v18 }
   0xf   :  { %v295_v4 = vor.u32 %v315_v2, %v294_v1  ;;  %v296_v6 = vld [vmem:[#allocation7 + $0x78] sm:$0xf0]  ;;  %v286_v9 = vld [vmem:[#allocation7 + $0x60] sm:$0xf]  ;;  %v313_v10 = vld [vmem:[#allocation7 + $0x64] sm:$0xf0] }
  0x10   :  { %v299_v7 = vor.u32 %v314_v5, %v296_v6  ;;  %v61_v8 = vsel %vm60_vm0, %v59_v3, 0.0  ;;  %v312_v11 = vld [vmem:[#allocation7 + $0x64] sm:$0xf]  ;;  %v287_v12 = vor.u32 %v313_v10, %v286_v9  ;;  %v288_v13 = vld [vmem:[#allocation7 + $0x68] sm:$0xf0]  ;;  %s436_s0 = smov [#allocation8]  }
  0x11   :  { %186 = vmatpush.bf16.msra.mxu0 %v295_v4  ;;  %62 = vadd.xlane.f32.xlu0 %v61_v8  ;;  %v291_v14 = vor.u32 %v312_v11, %v288_v13  ;;  %v278_v15 = vld [vmem:[#allocation7 + $0x50] sm:$0xf]  ;;  %v311_v16 = vld [vmem:[#allocation7 + $0x54] sm:$0xf0]  ;;  %v310_v17 = vld [vmem:[#allocation7 + $0x54] sm:$0xf] }
  0x12   :  { %199 = vmatpush.bf16.msra.mxu1 %v299_v7  ;;  %v279_v19 = vor.u32 %v311_v16, %v278_v15  ;;  %v280_v20 = vld [vmem:[#allocation7 + $0x58] sm:$0xf0]  ;;  %v270_v22 = vld [vmem:[#allocation7 + $0x40] sm:$0xf]  ;;  %v309_v23 = vld [vmem:[#allocation7 + $0x44] sm:$0xf0] }
  0x13   :  { %v283_v21 = vor.u32 %v310_v17, %v280_v20  ;;  %v308_v24 = vld [vmem:[#allocation7 + $0x44] sm:$0xf]  ;;  %v271_v25 = vor.u32 %v309_v23, %v270_v22  ;;  %v272_v26 = vld [vmem:[#allocation7 + $0x48] sm:$0xf0]  ;;  %v262_v29 = vld [vmem:[#allocation7 + $0x30] sm:$0xf] }
  0x14   :  { %v275_v27 = vor.u32 %v308_v24, %v272_v26  ;;  %v325_v28 = vpop.eup %324  ;;  %v307_v30 = vld [vmem:[#allocation7 + $0x34] sm:$0xf0]  ;;  %v306_v31 = vld [vmem:[#allocation7 + $0x34] sm:$0xf]  ;;  %v264_v33 = vld [vmem:[#allocation7 + $0x38] sm:$0xf0] }
  0x15   :  { %187 = vmatpush.bf16.msra.mxu0 %v287_v12  ;;  %v263_v32 = vor.u32 %v307_v30, %v262_v29  ;;  %v65_v34 = vmul.f32 128.0, %v325_v28  ;;  %v267_v35 = vor.u32 %v306_v31, %v264_v33  ;;  %v254_v36 = vld [vmem:[#allocation7 + $0x20] sm:$0xf]  ;;  %v305_v37 = vld [vmem:[#allocation7 + $0x24] sm:$0xf0]  ;;  %vm69_vm1 = vweird.f32 %v325_v28  ;;  %s223_s2 = sshll.u32 %s436_s0, 4  ;;  %s224_s2 = int_to_ptr.vmem [resolvable:$true] %s223_s2 }
  0x16   :  { %200 = vmatpush.bf16.msra.mxu1 %v291_v14  ;;  %v304_v38 = vld [vmem:[#allocation7 + $0x24] sm:$0xf]  ;;  %v255_v39 = vor.u32 %v305_v37, %v254_v36  ;;  %v256_v40 = vld [vmem:[#allocation7 + $0x28] sm:$0xf0]  ;;  %v246_v43 = vld [vmem:[#allocation7 + $0x10] sm:$0xf] }
  0x17   :  { %v66_v41 = vsub.f32 1.0, %v65_v34  ;;  %v259_v42 = vor.u32 %v304_v38, %v256_v40  ;;  %v303_v44 = vld [vmem:[#allocation7 + $0x14] sm:$0xf0]  ;;  %v302_v45 = vld [vmem:[#allocation7 + $0x14] sm:$0xf]  ;;  %s225_s30 = sshll.u32 %s479_s3, 4  ;;  %s226_s30 = int_to_ptr.hbm [resolvable:$true] %s225_s30 }
  0x18   :  { %v247_v46 = vor.u32 %v303_v44, %v246_v43  ;;  %v248_v47 = vld [vmem:[#allocation7 + $0x18] sm:$0xf0]  ;;  %v238_v48 = vld [vmem:[#allocation7] sm:$0xf]  ;;  %v301_v49 = vld [vmem:[#allocation7 + $0x4] sm:$0xf0] }
  0x19   :  { %188 = vmatpush.bf16.msra.mxu0 %v279_v19  ;;  %v251_v50 = vor.u32 %v302_v45, %v248_v47  ;;  %v300_v51 = vld [vmem:[#allocation7 + $0x4] sm:$0xf]  ;;  %v240_v52 = vld [vmem:[#allocation7 + $0x8] sm:$0xf0]  ;;  %v67_v53 = vmul.f32 %v325_v28, %v66_v41  ;;  %v239_v54 = vor.u32 %v301_v49, %v238_v48  ;;  %v323_v4 = vld [vmem:[#allocation5] ss:$0 sm:$0xff] }
  0x1a   :  { %201 = vmatpush.bf16.msra.mxu1 %v283_v21  ;;  %v243_v55 = vor.u32 %v300_v51, %v240_v52 }
  0x1b   :  { %v68_v56 = vadd.f32 %v325_v28, %v67_v53 }
  0x1d   :  { %189 = vmatpush.bf16.msra.mxu0 %v271_v25  ;;  %v70_v57 = vsel %vm69_vm1, %v325_v28, %v68_v56 }
  0x1e   :  { %202 = vmatpush.bf16.msra.mxu1 %v275_v27 }
  0x21   :  { %190 = vmatpush.bf16.msra.mxu0 %v263_v32 }
  0x22   :  { %203 = vmatpush.bf16.msra.mxu1 %v267_v35 }
  0x25   :  { %191 = vmatpush.bf16.msra.mxu0 %v255_v39 }
  0x26   :  { %204 = vmatpush.bf16.msra.mxu1 %v259_v42 }
  0x29   :  { %192 = vmatpush.bf16.msra.mxu0 %v247_v46 }
  0x2a   :  { %205 = vmatpush.bf16.msra.mxu1 %v251_v50 }
  0x2d   :  { %193 = vmatpush.bf16.msra.mxu0 %v239_v54 }
  0x2e   :  { %206 = vmatpush.bf16.msra.mxu1 %v243_v55 }
  0x84   :  { %v63_v58 = vpop.xlane.xlu0 %62 }
  0x85   :  { %v71_v59 = vmul.f32 %v70_v57, %v63_v58 }
  0x87   :  { %v72_v60 = vadd.f32 1e-05, %v71_v59 }
  0x89   :  { %326 = vrsqrt.f32 %v72_v60  ;;  %vm79_vm3 = vweird.f32 %v72_v60 }
  0x8f   :  { %v327_v61 = vpop.eup %326 }
  0x90   :  { %v74_v62 = vmul.f32 %v327_v61, %v72_v60  ;;  %vm80_vm2 = vweird.f32 %v327_v61 }
  0x91   :  { %vm81_vm4 = vmor %vm79_vm3, %vm80_vm2 }
  0x92   :  { %v75_v63 = vmul.f32 %v327_v61, %v74_v62 }
  0x94   :  { %v76_v1 = vmul.f32 0.5, %v75_v63 }
  0x96   :  { %v77_v2 = vsub.f32 1.5, %v76_v1 }
  0x98   :  { %v78_v3 = vmul.f32 %v327_v61, %v77_v2 }
  0x9a   :  { %v82_v5 = vsel %vm81_vm4, %v327_v61, %v78_v3 }
  0x9b   :  { %v83_v6 = vmul.f32 %v82_v5, %v466_v0 }
  0x9d   :  { %v88_v7 = vmul.f32 %v323_v4, %v83_v6 }
  0x9f   :  { %v89_v8 = vpack.c.bf16 %v88_v7, %v88_v7 }
  0xa1   :  { %194 = vmatmul.bf16.vlgmr.msra.gmra.mxu0 %v89_v8  ;;  %207 = vmatmul.bf16.vlgmr.msra.gmra.mxu1 %v89_v8 }
 0x11e   :  { %v195_v9 = vpop.f32.mrf.mxu0  ;;  %v208_v10 = vpop.f32.mrf.mxu1 }
 0x11f   :  { %v214_v11 = vrot.slane %v208_v10, 6 }
 0x121   :  { %v215_v12 = vsel %vm60_vm0, %v195_v9, %v214_v11 }
 0x122   :  { %217 = vst [vmem:[#allocation8] sm:$0xf] %v215_v12 }
 0x123   :  { %228 = dma.vmem_to_hbm [thread:$0]  %s224_s2, 64, %s226_s30, [#allocation4]  }
 0x126   :  { %v197_v0 = vpop.f32.mrf.mxu0  ;;  %v210_v13 = vpop.f32.mrf.mxu1 }
 0x127   :  { %428 = dma.done.wait [#allocation4], 64  }
 0x128   :  { %429 = vsyncadd [#allocation4], 4294967232 }
 0x129   :  { %233 = vsyncpa [#allocation3], 1 }
 0x12a   :  { %234 = vsyncpa [#allocation6], 1 }
 0x12b   :  { %235 = vsyncpa [#allocation4], 1 }

</bundles_post_ra>
